<compile_context>
chip_gen: v7x
topology: tpu7x:2x2x1
jax: 0.10.0
libtpu: 0.0.40
codegen_flags: <defaults>
</compile_context>

<pallas_src>
import jax
import jax.numpy as jnp
from jax.experimental import pallas as pl
from jax.experimental.pallas import tpu as pltpu


def _ceil_div(a, b):
    return -(-a // b)


def _round_up(x, m):
    return _ceil_div(x, m) * m


def _make_kernel(tb, n_sub, steps_per_chunk, win_start, win_len, full_window, align8):
    """Kernel closure over static tile/window sizes.

    tb:            batch rows per tile
    n_sub:         DMA sub-copies per tile (concurrency)
    steps_per_chunk: inner grid extent per outer chunk
    win_start:     flat start of the window, (T - tau) * D
    win_len:       flat window width, tau * D
    full_window:   True when tau == T (contiguous tile copy)
    align8:        tile starts are multiples of 8 (emit pl.multiple_of hints)
    """
    sub_tb = tb // n_sub

    def kernel(x_hbm, w_ref, b_ref, o_ref, xbuf, sem):
        step = pl.program_id(1)
        nsteps = pl.num_programs(1)
        tile = pl.program_id(0) * steps_per_chunk + step

        def window_copies(t, slot):
            base = t * tb
            ops = []
            for s in range(n_sub):
                start = base + s * sub_tb
                if align8:
                    start = pl.multiple_of(start, 8)
                if full_window:
                    src = x_hbm.at[pl.ds(start, sub_tb)]
                else:
                    src = x_hbm.at[pl.ds(start, sub_tb), pl.ds(win_start, win_len)]
                dst = xbuf.at[slot, pl.ds(s * sub_tb, sub_tb)]
                ops.append(pltpu.make_async_copy(src, dst, sem.at[slot, s]))
            return ops

        # Prime the pipeline with this chunk's first tile.
        @pl.when(step == 0)
        def _():
            for op in window_copies(tile, 0):
                op.start()

        # Prefetch the next tile of this chunk into the other slot.
        @pl.when(step + 1 < nsteps)
        def _():
            for op in window_copies(tile + 1, (step + 1) % 2):
                op.start()

        slot = step % 2
        for op in window_copies(tile, slot):
            op.wait()

        x = xbuf[slot]                                   # [tb, tau*D]
        acc = jnp.dot(x, w_ref[...], preferred_element_type=jnp.float32)
        o_ref[...] = (acc + b_ref[...]).astype(o_ref.dtype)

    return kernel


def quantile_output(varphi, weights, biases, tau, *,
                    vmem_budget_bytes=None, max_batch_tile=None,
                    force_pallas=False):
    """varphi: [B, T, D]; weights: [Q, D]; biases: [Q]  ->  [B, tau, Q]."""
    B, T, D = varphi.shape
    Q = weights.shape[0]
    assert 1 <= tau <= T
    t_off = T - tau

    # Per-quantile Linear(D, 1) weights stay in f32 (module semantics).
    w = weights.astype(jnp.float32).T                    # [D, Q]
    bias = biases.astype(jnp.float32)                    # [Q]

    KD = tau * D                                         # flattened window width
    NQ = tau * Q                                         # flattened output width

    def xla_path(x):
        out = jnp.einsum("btd,dq->btq", x[:, t_off:, :].astype(jnp.float32), w,
                         preferred_element_type=jnp.float32) + bias
        return out.astype(varphi.dtype)

    # Tiny problems: a fused XLA einsum beats any kernel launch.
    if not force_pallas and B * tau * D < (1 << 16):
        return xla_path(varphi)

    itemsize = jnp.dtype(varphi.dtype).itemsize
    w2_resident = 2 * _round_up(KD, 8) * _round_up(NQ, 128) * 4
    if w2_resident > (8 << 20):
        # TODO(synk): for very large tau*D the block-diagonal weight no longer
        # fits comfortably in VMEM; tile over tau instead of this XLA fallback.
        return xla_path(varphi)

    # ---- VMEM budget / tile sizing (v5e/v6e: 128 MiB, v7x: 64 MiB per core) ---
    try:
        vmem_cap = int(pltpu.get_tpu_info().vmem_capacity_bytes)
    except Exception:
        vmem_cap = 64 << 20                              # conservative (v7x class)
    if vmem_budget_bytes is None:
        vmem_budget_bytes = vmem_cap // 4                # headroom for 2nd core, Mosaic scratch

    # Padded per-batch-row VMEM: activation double buffer + pipelined out block.
    per_batch = 2 * _round_up(KD, 128) * itemsize + 2 * _round_up(NQ, 128) * itemsize
    fixed = w2_resident + 2 * 8 * _round_up(NQ, 128) * 4 + (1 << 20)

    tb_max = max(1, (vmem_budget_bytes - fixed) // per_batch)
    if max_batch_tile is not None:
        tb_max = min(tb_max, max_batch_tile)
    tb_max = max(1, min(tb_max, B))

    # Minimize the XLA remainder tail: tb ~ ceil(B / ceil(B / tb_max)), 8-aligned.
    n_target = _ceil_div(B, tb_max)
    tb = _ceil_div(B, n_target)
    if tb < B:
        tb = _round_up(tb, 8)       # aligned matmul M-dim + legal (tb, NQ) out block
    tb = min(tb, B)

    b_main = (B // tb) * tb
    n_tiles = b_main // tb

    # Two chunks so v7x runs one pipeline per TensorCore; each chunk primes its
    # own double buffer at step 0, so this is also correct on 1-TC chips where
    # the "parallel" axis simply iterates sequentially.
    if n_tiles >= 2 and n_tiles % 2 == 0:
        outer, steps = 2, n_tiles // 2
    else:
        outer, steps = 1, n_tiles

    # DMA concurrency: split each tile's window copy along the batch axis.
    if tb % 4 == 0 and tb // 4 >= 8:
        n_sub = 4
    elif tb % 2 == 0:
        n_sub = 2
    else:
        n_sub = 1
    sub_tb = tb // n_sub
    align8 = (tb % 8 == 0) and (sub_tb % 8 == 0)
    full_window = (t_off == 0)                           # contiguous tile copy

    est = fixed + per_batch * _round_up(tb, 8) + (2 << 20)
    vmem_limit = int(min((vmem_cap * 3) // 4, max(est + (4 << 20), 32 << 20)))

    # Flattened views are free (contiguous) reshapes; the activation HBM read
    # still happens exactly once, inside the kernel's DMA.
    x2d = varphi.reshape(B, T * D)
    w2 = jnp.kron(jnp.eye(tau, dtype=jnp.float32), w)    # [tau*D, tau*Q] block-diag
    b2 = jnp.tile(bias, tau).reshape(1, NQ)              # [1, tau*Q]

    cost = pl.CostEstimate(
        flops=2 * b_main * KD * NQ,
        transcendentals=0,
        bytes_accessed=(b_main * KD + KD * NQ + NQ + b_main * NQ) * itemsize,
    )

    out_flat = pl.pallas_call(
        _make_kernel(tb, n_sub, steps, t_off * D, KD, full_window, align8),
        out_shape=jax.ShapeDtypeStruct((b_main, NQ), varphi.dtype),
        grid=(outer, steps),
        in_specs=[
            pl.BlockSpec(memory_space=pl.ANY),           # activations stay in HBM
            pl.BlockSpec((KD, NQ), lambda c, s: (0, 0)),  # resident block-diag weights
            pl.BlockSpec((1, NQ), lambda c, s: (0, 0)),   # resident bias
        ],
        out_specs=pl.BlockSpec((tb, NQ), lambda c, s: (c * steps + s, 0)),
        scratch_shapes=[
            pltpu.VMEM((2, tb, KD), varphi.dtype),       # activation double buffer
            pltpu.SemaphoreType.DMA((2, n_sub)),
        ],
        compiler_params=pltpu.CompilerParams(
            dimension_semantics=("parallel", "arbitrary"),
            vmem_limit_bytes=vmem_limit,
        ),
        cost_estimate=cost,
    )(x2d, w2, b2)

    out_main = out_flat.reshape(b_main, tau, Q)
    if b_main == B:
        return out_main

    # Remainder batches (< tb): negligible work on the plain XLA path so the
    # kernel's manual DMA never reads past B.
    tail = xla_path(varphi[b_main:])
    return jnp.concatenate([out_main, tail], axis=0)


if __name__ == "__main__":
    # Shapes consistent with the module's forward:
    #   batch B=2, sequence T=8, hidden D=32, tau=4, quantiles Q=3.
    B, T, D = 2, 8, 32
    tau = 4
    quantile = (0.1, 0.5, 0.9)
    Q = len(quantile)

    key = jax.random.PRNGKey(0)
    k_x, k_w, k_b, k_x2 = jax.random.split(key, 4)

    varphi = jax.random.normal(k_x, (B, T, D), dtype=jnp.float32)
    # One Linear(D, 1) per quantile, stacked: weights [Q, D], biases [Q].
    weights = jax.random.normal(k_w, (Q, D), dtype=jnp.float32) * 0.1
    biases = jax.random.normal(k_b, (Q,), dtype=jnp.float32) * 0.1

    def reference(x, tau_):
        return jnp.einsum("btd,qd->btq", x[:, x.shape[1] - tau_:, :], weights) + biases

    # 1) Small single-tile case (output block == full array).
    out = quantile_output(varphi, weights, biases, tau, force_pallas=True)
    out = jax.block_until_ready(out)
    assert out.shape == (B, tau, Q)
    assert jnp.allclose(out, reference(varphi, tau), atol=1e-5, rtol=1e-5)

    # 2) Multi-tile case: small forced batch tile exercises the dual-chunk
    #    ("parallel" outer) grid, the double-buffered prefetch pipeline, the
    #    multi-descriptor DMA split, and the batch-remainder path.
    B2 = 36
    varphi2 = jax.random.normal(k_x2, (B2, T, D), dtype=jnp.float32)
    out2 = quantile_output(varphi2, weights, biases, tau,
                           force_pallas=True, max_batch_tile=8)
    out2 = jax.block_until_ready(out2)
    assert out2.shape == (B2, tau, Q)
    assert jnp.allclose(out2, reference(varphi2, tau), atol=1e-5, rtol=1e-5)

    # 3) tau == T: fully contiguous window DMA path.
    out3 = quantile_output(varphi, weights, biases, T, force_pallas=True)
    out3 = jax.block_until_ready(out3)
    assert out3.shape == (B, T, Q)
    assert jnp.allclose(out3, reference(varphi, T), atol=1e-5, rtol=1e-5)

    print("KERNEL_OK")
</pallas_src>

<mosaic_0001>
module attributes {stable_mosaic.version = 11 : i64} {
  func.func @kernel(%arg0: i32, %arg1: i32, %arg2: memref<2x256xf32, #tpu.memory_space<any>>, %arg3: memref<128x12xf32, #tpu.memory_space<vmem>>, %arg4: memref<1x12xf32, #tpu.memory_space<vmem>>, %arg5: memref<2x12xf32, #tpu.memory_space<vmem>>, %arg6: memref<2x2x128xf32, #tpu.memory_space<vmem>>, %arg7: memref<2x2x!tpu.dma_semaphore, #tpu.memory_space<semaphore_mem>>) attributes {dimension_semantics = [#tpu.dimension_semantics<parallel>, #tpu.dimension_semantics<arbitrary>], iteration_bounds = array<i64: 1, 1>, scalar_prefetch = 0 : i64, scratch_operands = 2 : i64, tpu.core_type = #tpu.core_type<tc>, window_params = [{}, {pipeline_mode = #tpu.pipeline_mode<synchronous>, transform_indices = @transform_1, window_bounds = array<i64: 128, 12>}, {pipeline_mode = #tpu.pipeline_mode<synchronous>, transform_indices = @transform_2, window_bounds = array<i64: 1, 12>}, {transform_indices = @transform_3, window_bounds = array<i64: 2, 12>}]} {
    %c1_i32 = arith.constant 1 : i32
    %0 = arith.muli %arg0, %c1_i32 : i32
    %1 = arith.addi %0, %arg1 : i32
    %c0_i32 = arith.constant 0 : i32
    %2 = arith.cmpi eq, %arg1, %c0_i32 : i32
    %3 = arith.extui %2 : i1 to i32
    %c0_i32_0 = arith.constant 0 : i32
    %4 = arith.cmpi ne, %3, %c0_i32_0 : i32
    scf.if %4 {
      %c2_i32_26 = arith.constant 2 : i32
      %41 = arith.muli %1, %c2_i32_26 : i32
      %c0_i32_27 = arith.constant 0 : i32
      %42 = arith.addi %41, %c0_i32_27 : i32
      %c1_i32_28 = arith.constant 1 : i32
      %43 = arith.addi %41, %c1_i32_28 : i32
      %c0_i32_29 = arith.constant 0 : i32
      %c0_i32_30 = arith.constant 0 : i32
      %c0_i32_31 = arith.constant 0 : i32
      %c128_i32_32 = arith.constant 128 : i32
      %44 = tpu.memref_slice %arg2[%42, %c128_i32_32] : memref<2x256xf32, #tpu.memory_space<any>> -> memref<1x128xf32, #tpu.memory_space<any>>
      %c0_i32_33 = arith.constant 0 : i32
      %c0_i32_34 = arith.constant 0 : i32
      %45 = tpu.memref_slice %arg6[%c0_i32_29, %c0_i32_33, %c0_i32_34] : memref<2x2x128xf32, #tpu.memory_space<vmem>> -> memref<1x1x128xf32, #tpu.memory_space<vmem>>
      %46 = tpu.memref_squeeze %45 : memref<1x1x128xf32, #tpu.memory_space<vmem>> -> memref<1x128xf32, #tpu.memory_space<vmem>>
      %47 = tpu.memref_slice %arg7[%c0_i32_30, %c0_i32_31] : memref<2x2x!tpu.dma_semaphore, #tpu.memory_space<semaphore_mem>> -> memref<1x1x!tpu.dma_semaphore, #tpu.memory_space<semaphore_mem>>
      %48 = tpu.memref_squeeze %47 : memref<1x1x!tpu.dma_semaphore, #tpu.memory_space<semaphore_mem>> -> memref<!tpu.dma_semaphore, #tpu.memory_space<semaphore_mem>>
      tpu.enqueue_dma source(%44 : memref<1x128xf32, #tpu.memory_space<any>>) target(%46 : memref<1x128xf32, #tpu.memory_space<vmem>>) target_semaphore(%48 : memref<!tpu.dma_semaphore, #tpu.memory_space<semaphore_mem>>)
      %c0_i32_35 = arith.constant 0 : i32
      %c0_i32_36 = arith.constant 0 : i32
      %c1_i32_37 = arith.constant 1 : i32
      %c128_i32_38 = arith.constant 128 : i32
      %49 = tpu.memref_slice %arg2[%43, %c128_i32_38] : memref<2x256xf32, #tpu.memory_space<any>> -> memref<1x128xf32, #tpu.memory_space<any>>
      %c1_i32_39 = arith.constant 1 : i32
      %c0_i32_40 = arith.constant 0 : i32
      %50 = tpu.memref_slice %arg6[%c0_i32_35, %c1_i32_39, %c0_i32_40] : memref<2x2x128xf32, #tpu.memory_space<vmem>> -> memref<1x1x128xf32, #tpu.memory_space<vmem>>
      %51 = tpu.memref_squeeze %50 : memref<1x1x128xf32, #tpu.memory_space<vmem>> -> memref<1x128xf32, #tpu.memory_space<vmem>>
      %52 = tpu.memref_slice %arg7[%c0_i32_36, %c1_i32_37] : memref<2x2x!tpu.dma_semaphore, #tpu.memory_space<semaphore_mem>> -> memref<1x1x!tpu.dma_semaphore, #tpu.memory_space<semaphore_mem>>
      %53 = tpu.memref_squeeze %52 : memref<1x1x!tpu.dma_semaphore, #tpu.memory_space<semaphore_mem>> -> memref<!tpu.dma_semaphore, #tpu.memory_space<semaphore_mem>>
      tpu.enqueue_dma source(%49 : memref<1x128xf32, #tpu.memory_space<any>>) target(%51 : memref<1x128xf32, #tpu.memory_space<vmem>>) target_semaphore(%53 : memref<!tpu.dma_semaphore, #tpu.memory_space<semaphore_mem>>)
    } else {
    }
    %c1_i32_1 = arith.constant 1 : i32
    %5 = arith.addi %arg1, %c1_i32_1 : i32
    %c1_i32_2 = arith.constant 1 : i32
    %6 = arith.cmpi slt, %5, %c1_i32_2 : i32
    %7 = arith.extui %6 : i1 to i32
    %c0_i32_3 = arith.constant 0 : i32
    %8 = arith.cmpi ne, %7, %c0_i32_3 : i32
    scf.if %8 {
      %c1_i32_26 = arith.constant 1 : i32
      %41 = arith.addi %1, %c1_i32_26 : i32
      %c1_i32_27 = arith.constant 1 : i32
      %42 = arith.addi %arg1, %c1_i32_27 : i32
      %c2_i32_28 = arith.constant 2 : i32
      %c0_i32_29 = arith.constant 0 : i32
      %43 = arith.cmpi eq, %c2_i32_28, %c0_i32_29 : i32
      %c1_i32_30 = arith.constant 1 : i32
      %44 = arith.select %43, %c1_i32_30, %c2_i32_28 : i32
      %45 = arith.remsi %42, %44 : i32
      %c0_i32_31 = arith.constant 0 : i32
      %46 = arith.cmpi ne, %45, %c0_i32_31 : i32
      %c0_i32_32 = arith.constant 0 : i32
      %47 = arith.cmpi slt, %45, %c0_i32_32 : i32
      %c0_i32_33 = arith.constant 0 : i32
      %48 = arith.cmpi slt, %44, %c0_i32_33 : i32
      %49 = arith.xori %47, %48 : i1
      %50 = arith.andi %49, %46 : i1
      %51 = arith.addi %45, %44 : i32
      %52 = arith.select %50, %51, %45 : i32
      %c2_i32_34 = arith.constant 2 : i32
      %53 = arith.muli %41, %c2_i32_34 : i32
      %c0_i32_35 = arith.constant 0 : i32
      %54 = arith.addi %53, %c0_i32_35 : i32
      %c1_i32_36 = arith.constant 1 : i32
      %55 = arith.addi %53, %c1_i32_36 : i32
      %c0_i32_37 = arith.constant 0 : i32
      %c128_i32_38 = arith.constant 128 : i32
      %56 = tpu.memref_slice %arg2[%54, %c128_i32_38] : memref<2x256xf32, #tpu.memory_space<any>> -> memref<1x128xf32, #tpu.memory_space<any>>
      %c0_i32_39 = arith.constant 0 : i32
      %c0_i32_40 = arith.constant 0 : i32
      %57 = tpu.memref_slice %arg6[%52, %c0_i32_39, %c0_i32_40] : memref<2x2x128xf32, #tpu.memory_space<vmem>> -> memref<1x1x128xf32, #tpu.memory_space<vmem>>
      %58 = tpu.memref_squeeze %57 : memref<1x1x128xf32, #tpu.memory_space<vmem>> -> memref<1x128xf32, #tpu.memory_space<vmem>>
      %59 = tpu.memref_slice %arg7[%52, %c0_i32_37] : memref<2x2x!tpu.dma_semaphore, #tpu.memory_space<semaphore_mem>> -> memref<1x1x!tpu.dma_semaphore, #tpu.memory_space<semaphore_mem>>
      %60 = tpu.memref_squeeze %59 : memref<1x1x!tpu.dma_semaphore, #tpu.memory_space<semaphore_mem>> -> memref<!tpu.dma_semaphore, #tpu.memory_space<semaphore_mem>>
      tpu.enqueue_dma source(%56 : memref<1x128xf32, #tpu.memory_space<any>>) target(%58 : memref<1x128xf32, #tpu.memory_space<vmem>>) target_semaphore(%60 : memref<!tpu.dma_semaphore, #tpu.memory_space<semaphore_mem>>)
      %c1_i32_41 = arith.constant 1 : i32
      %c128_i32_42 = arith.constant 128 : i32
      %61 = tpu.memref_slice %arg2[%55, %c128_i32_42] : memref<2x256xf32, #tpu.memory_space<any>> -> memref<1x128xf32, #tpu.memory_space<any>>
      %c1_i32_43 = arith.constant 1 : i32
      %c0_i32_44 = arith.constant 0 : i32
      %62 = tpu.memref_slice %arg6[%52, %c1_i32_43, %c0_i32_44] : memref<2x2x128xf32, #tpu.memory_space<vmem>> -> memref<1x1x128xf32, #tpu.memory_space<vmem>>
      %63 = tpu.memref_squeeze %62 : memref<1x1x128xf32, #tpu.memory_space<vmem>> -> memref<1x128xf32, #tpu.memory_space<vmem>>
      %64 = tpu.memref_slice %arg7[%52, %c1_i32_41] : memref<2x2x!tpu.dma_semaphore, #tpu.memory_space<semaphore_mem>> -> memref<1x1x!tpu.dma_semaphore, #tpu.memory_space<semaphore_mem>>
      %65 = tpu.memref_squeeze %64 : memref<1x1x!tpu.dma_semaphore, #tpu.memory_space<semaphore_mem>> -> memref<!tpu.dma_semaphore, #tpu.memory_space<semaphore_mem>>
      tpu.enqueue_dma source(%61 : memref<1x128xf32, #tpu.memory_space<any>>) target(%63 : memref<1x128xf32, #tpu.memory_space<vmem>>) target_semaphore(%65 : memref<!tpu.dma_semaphore, #tpu.memory_space<semaphore_mem>>)
    } else {
    }
    %c2_i32 = arith.constant 2 : i32
    %c0_i32_4 = arith.constant 0 : i32
    %9 = arith.cmpi eq, %c2_i32, %c0_i32_4 : i32
    %c1_i32_5 = arith.constant 1 : i32
    %10 = arith.select %9, %c1_i32_5, %c2_i32 : i32
    %11 = arith.remsi %arg1, %10 : i32
    %c0_i32_6 = arith.constant 0 : i32
    %12 = arith.cmpi ne, %11, %c0_i32_6 : i32
    %c0_i32_7 = arith.constant 0 : i32
    %13 = arith.cmpi slt, %11, %c0_i32_7 : i32
    %c0_i32_8 = arith.constant 0 : i32
    %14 = arith.cmpi slt, %10, %c0_i32_8 : i32
    %15 = arith.xori %13, %14 : i1
    %16 = arith.andi %15, %12 : i1
    %17 = arith.addi %11, %10 : i32
    %18 = arith.select %16, %17, %11 : i32
    %c2_i32_9 = arith.constant 2 : i32
    %19 = arith.muli %1, %c2_i32_9 : i32
    %c0_i32_10 = arith.constant 0 : i32
    %20 = arith.addi %19, %c0_i32_10 : i32
    %c1_i32_11 = arith.constant 1 : i32
    %21 = arith.addi %19, %c1_i32_11 : i32
    %c0_i32_12 = arith.constant 0 : i32
    %c128_i32 = arith.constant 128 : i32
    %22 = tpu.memref_slice %arg2[%20, %c128_i32] : memref<2x256xf32, #tpu.memory_space<any>> -> memref<1x128xf32, #tpu.memory_space<any>>
    %c0_i32_13 = arith.constant 0 : i32
    %c0_i32_14 = arith.constant 0 : i32
    %23 = tpu.memref_slice %arg6[%18, %c0_i32_13, %c0_i32_14] : memref<2x2x128xf32, #tpu.memory_space<vmem>> -> memref<1x1x128xf32, #tpu.memory_space<vmem>>
    %24 = tpu.memref_squeeze %23 : memref<1x1x128xf32, #tpu.memory_space<vmem>> -> memref<1x128xf32, #tpu.memory_space<vmem>>
    %25 = tpu.memref_slice %arg7[%18, %c0_i32_12] : memref<2x2x!tpu.dma_semaphore, #tpu.memory_space<semaphore_mem>> -> memref<1x1x!tpu.dma_semaphore, #tpu.memory_space<semaphore_mem>>
    %26 = tpu.memref_squeeze %25 : memref<1x1x!tpu.dma_semaphore, #tpu.memory_space<semaphore_mem>> -> memref<!tpu.dma_semaphore, #tpu.memory_space<semaphore_mem>>
    tpu.wait_dma2 semaphore(%26 : memref<!tpu.dma_semaphore, #tpu.memory_space<semaphore_mem>>) src(%22 : memref<1x128xf32, #tpu.memory_space<any>>) dst(%24 : memref<1x128xf32, #tpu.memory_space<vmem>>)
    %c1_i32_15 = arith.constant 1 : i32
    %c128_i32_16 = arith.constant 128 : i32
    %27 = tpu.memref_slice %arg2[%21, %c128_i32_16] : memref<2x256xf32, #tpu.memory_space<any>> -> memref<1x128xf32, #tpu.memory_space<any>>
    %c1_i32_17 = arith.constant 1 : i32
    %c0_i32_18 = arith.constant 0 : i32
    %28 = tpu.memref_slice %arg6[%18, %c1_i32_17, %c0_i32_18] : memref<2x2x128xf32, #tpu.memory_space<vmem>> -> memref<1x1x128xf32, #tpu.memory_space<vmem>>
    %29 = tpu.memref_squeeze %28 : memref<1x1x128xf32, #tpu.memory_space<vmem>> -> memref<1x128xf32, #tpu.memory_space<vmem>>
    %30 = tpu.memref_slice %arg7[%18, %c1_i32_15] : memref<2x2x!tpu.dma_semaphore, #tpu.memory_space<semaphore_mem>> -> memref<1x1x!tpu.dma_semaphore, #tpu.memory_space<semaphore_mem>>
    %31 = tpu.memref_squeeze %30 : memref<1x1x!tpu.dma_semaphore, #tpu.memory_space<semaphore_mem>> -> memref<!tpu.dma_semaphore, #tpu.memory_space<semaphore_mem>>
    tpu.wait_dma2 semaphore(%31 : memref<!tpu.dma_semaphore, #tpu.memory_space<semaphore_mem>>) src(%27 : memref<1x128xf32, #tpu.memory_space<any>>) dst(%29 : memref<1x128xf32, #tpu.memory_space<vmem>>)
    %32 = arith.index_cast %18 : i32 to index
    %c0 = arith.constant 0 : index
    %c0_19 = arith.constant 0 : index
    %33 = vector.load %arg6[%32, %c0, %c0_19] : memref<2x2x128xf32, #tpu.memory_space<vmem>>, vector<1x2x128xf32>
    %34 = vector.shape_cast %33 : vector<1x2x128xf32> to vector<2x128xf32>
    %c0_20 = arith.constant 0 : index
    %c0_21 = arith.constant 0 : index
    %35 = vector.load %arg3[%c0_20, %c0_21] : memref<128x12xf32, #tpu.memory_space<vmem>>, vector<128x12xf32>
    %cst = arith.constant dense<0.000000e+00> : vector<2x12xf32>
    %36 = tpu.matmul %34, %35, %cst {dimension_numbers = #tpu.dot_dimension_numbers<[1], [0], [0], [1], [0, 0, 1, 1], [], []>} : vector<2x128xf32>, vector<128x12xf32>, vector<2x12xf32> -> vector<2x12xf32>
    %c0_22 = arith.constant 0 : index
    %c0_23 = arith.constant 0 : index
    %37 = vector.load %arg4[%c0_22, %c0_23] : memref<1x12xf32, #tpu.memory_space<vmem>>, vector<1x12xf32>
    %38 = vector.broadcast %37 : vector<1x12xf32> to vector<2x12xf32>
    %39 = arith.addf %36, %38 : vector<2x12xf32>
    %c0_24 = arith.constant 0 : index
    %c0_25 = arith.constant 0 : index
    %40 = vector.load %arg5[%c0_24, %c0_25] : memref<2x12xf32, #tpu.memory_space<vmem>>, vector<2x12xf32>
    tpu.vector_store %arg5[%c0_24, %c0_25], %39 {strides = array<i32>} : memref<2x12xf32, #tpu.memory_space<vmem>>, vector<2x12xf32>,
    return
  }
  func.func @transform_1(%arg0: i32, %arg1: i32) -> (i32, i32) {
    %c0_i32 = arith.constant 0 : i32
    %c0_i32_0 = arith.constant 0 : i32
    %c0_i32_1 = arith.constant 0 : i32
    return %c0_i32, %c0_i32_0 : i32, i32
  }
  func.func @transform_2(%arg0: i32, %arg1: i32) -> (i32, i32) {
    %c0_i32 = arith.constant 0 : i32
    %c0_i32_0 = arith.constant 0 : i32
    %c0_i32_1 = arith.constant 0 : i32
    return %c0_i32, %c0_i32_0 : i32, i32
  }
  func.func @transform_3(%arg0: i32, %arg1: i32) -> (i32, i32) {
    %c1_i32 = arith.constant 1 : i32
    %0 = arith.muli %arg0, %c1_i32 : i32
    %1 = arith.addi %0, %arg1 : i32
    %c0_i32 = arith.constant 0 : i32
    %c0_i32_0 = arith.constant 0 : i32
    return %1, %c0_i32 : i32, i32
  }
}

</mosaic_0001>

<bundles_post_ra>
// kernel: tpu_custom_call.1
= control target key start
LH: loop header
LB: loop body
LE: loop exit
PB: predicated region body
PF: predicated region fallthrough
CT: control target
= control target key end

     0   :  { %8 = vsyncpa [#allocation5], 0  ;;  %s706_s0 = inlined_call_operand.vmem [shape: f32[2,256], index: 0, kind: input, shape index: {}]   ;;  %s707_s1 = inlined_call_operand.vmem [shape: f32[128,12], index: 1, kind: input, shape index: {}]   ;;  %s708_s2 = inlined_call_operand.vmem [shape: f32[1,12], index: 2, kind: input, shape index: {}]   ;;  %s709_s3 = inlined_call_operand.hbm [shape: f32[2,12], index: 3, kind: output, shape index: {}]  }
   0x1   :  { %v487_v0 = vld [vmem:[%s706_s0 + $0x2] sm:$0x1] }
   0x2   :  { %45 = vst [vmem:[#allocation2] sm:$0x1] %v487_v0 }
   0x3   :  { %70 = vsyncadd [#allocation3], 16  ;;  %v491_v1 = vld [vmem:[%s706_s0 + $0x3] sm:$0x1] }
   0x4   :  { %97 = vst [vmem:[#allocation2 + $0x1] sm:$0x1] %v491_v1 }
   0x5   :  { %122 = vsyncadd [#allocation3 + $0x1], 16 }
   0x6   :  { %607 = dma.done.wait [#allocation3], 16 }
   0x7   :  { %608 = vsyncadd [#allocation3], 4294967280 }
   0x8   :  { %609 = dma.done.wait [#allocation3 + $0x1], 16 }
   0x9   :  { %610 = vsyncadd [#allocation3 + $0x1], 4294967280  ;;  %v613_v2 = vmov 0.0|0.0   ;;  %vm614_vm0 = vmmov 0   ;;  %v615_v3 = vmov 0.0   ;;  %v268_v4 = vld [vmem:[%s707_s1] sm:$0xff] }
   0xa   :  { %557 = vmatprep.subr.bf16.mxu0 %v613_v2  ;;  %554 = vmatprep.mubr.msk.f32.mxu0 %vm614_vm0, %v615_v3  ;;  %v269_v5 = vld [vmem:[%s707_s1 + $0x8] sm:$0xff]  ;;  %v270_v6 = vld [vmem:[%s707_s1 + $0x10] sm:$0xff]  ;;  %v271_v8 = vld [vmem:[%s707_s1 + $0x18] sm:$0xff]  ;;  %s616_s21 = smov [#allocation4]   ;;  %vm361_vm1 = vcmask 91136  }
   0xb   :  { %v558_v7 = vpack.c.bf16 %v269_v5, %v268_v4  ;;  %v561_v9 = vpack.c.bf16 %v271_v8, %v270_v6  ;;  %v272_v10 = vld [vmem:[%s707_s1 + $0x20] sm:$0xff]  ;;  %v273_v11 = vld [vmem:[%s707_s1 + $0x28] sm:$0xff]  ;;  %v274_v13 = vld [vmem:[%s707_s1 + $0x30] sm:$0xff]  ;;  %s372_s22 = sshll.u32 %s616_s21, 4  ;;  %s373_s22 = int_to_ptr.vmem [resolvable:$true] %s372_s22 }
   0xc   :  { %v564_v12 = vpack.c.bf16 %v273_v11, %v272_v10  ;;  %v275_v14 = vld [vmem:[%s707_s1 + $0x38] sm:$0xff]  ;;  %v276_v16 = vld [vmem:[%s707_s1 + $0x40] sm:$0xff]  ;;  %v277_v17 = vld [vmem:[%s707_s1 + $0x48] sm:$0xff]  ;;  %s585_s23 = scalar_lea.vmem %s373_s22, 32  ;;  %p590_p1 = scmp.lt.s32.totalorder %s373_s22, %s373_s22 }
   0xd   :  { %559 = vmatpush3.bf16.msra.mxu0 %v558_v7  ;;  %v567_v15 = vpack.c.bf16 %v275_v14, %v274_v13  ;;  %v570_v18 = vpack.c.bf16 %v277_v17, %v276_v16  ;;  %v278_v19 = vld [vmem:[%s707_s1 + $0x50] sm:$0xff]  ;;  %v279_v20 = vld [vmem:[%s707_s1 + $0x58] sm:$0xff]  ;;  %v280_v22 = vld [vmem:[%s707_s1 + $0x60] sm:$0xff]  ;;  %p586_p0 = scmp.ne.s32.totalorder %s373_s22, %s585_s23  ;;  %p591_p2 = scmp.lt.s32.totalorder %s585_s23, %s585_s23 }
   0xe   :  { %560 = vmatprep.subr.bf16.mxu0 %v613_v2  ;;  %v573_v21 = vpack.c.bf16 %v279_v20, %v278_v19  ;;  %v281_v23 = vld [vmem:[%s707_s1 + $0x68] sm:$0xff]  ;;  %v282_v25 = vld [vmem:[%s707_s1 + $0x70] sm:$0xff]  ;;  %v283_v26 = vld [vmem:[%s707_s1 + $0x78] sm:$0xff] }
   0xf   :  { %v576_v24 = vpack.c.bf16 %v281_v23, %v280_v22  ;;  %v579_v27 = vpack.c.bf16 %v283_v26, %v282_v25  ;;  %v267_v28 = vld [vmem:[#allocation2] sm:$0x3]  ;;  %p592_p3 = por %p591_p2, %p590_p1 }
  0x10   :  { %v500_v29 = vld [vmem:[%s708_s2] ss:$0 sm:$0xff] }
  0x11   :  { %562 = vmatpush3.bf16.msra.mxu0 %v561_v9  ;;  %p593_p4 = pnand %p592_p3, %p586_p0 }
  0x12   :  { %563 = vmatprep.subr.bf16.mxu0 %v613_v2 }
  0x15   :  { %565 = vmatpush3.bf16.msra.mxu0 %v564_v12 }
  0x16   :  { %566 = vmatprep.subr.bf16.mxu0 %v613_v2 }
  0x19   :  { %568 = vmatpush3.bf16.msra.mxu0 %v567_v15 }
  0x1a   :  { %569 = vmatprep.subr.bf16.mxu0 %v613_v2 }
  0x1d   :  { %571 = vmatpush3.bf16.msra.mxu0 %v570_v18 }
  0x1e   :  { %572 = vmatprep.subr.bf16.mxu0 %v613_v2 }
  0x21   :  { %574 = vmatpush3.bf16.msra.mxu0 %v573_v21 }
  0x22   :  { %575 = vmatprep.subr.bf16.mxu0 %v613_v2 }
  0x25   :  { %577 = vmatpush3.bf16.msra.mxu0 %v576_v24 }
  0x26   :  { %578 = vmatprep.subr.bf16.mxu0 %v613_v2 }
  0x29   :  { %580 = vmatpush3.bf16.msra.mxu0 %v579_v27 }
  0x2c   :  { %555 = vmatmul.mubr.f32.vlgmr.msra.gmra.mrb[0].mxu0 %v267_v28 }
  0xff   :  { %v357_v30 = vpop.f32.mrb[0].mxu0 }
 0x100   :  { %v358_v31 = vadd.f32 %v500_v29, %v357_v30  ;;  %v556_v32 = vpop.f32.mrb[1].mxu0 }
 0x102   :  { %362 = vst.msk [vmem:[#allocation4] sm:$0x3] %vm361_vm1, %v358_v31 }
 0x103   :  { %596 = shalt.err (!%p593_p4)
}
 0x104   :  { %s597_s25 = scalar_lea.hbm %s709_s3, 32 }
 0x105   :  { %p598_p5 = scmp.ne.s32.totalorder %s709_s3, %s597_s25  ;;  %p601_p6 = scmp.lt.u32.totalorder %s597_s25, %s709_s3 }
 0x107   :  { %p603_p7 = pnand %p601_p6, %p598_p5 }
 0x109   :  { %606 = shalt.err (!%p603_p7)
}
 0x10a   :  { %375 = dma.vmem_to_hbm [thread:$0]  %s373_s22, 32, %s709_s3, [#allocation5]  }
 0x10b   :  { %611 = dma.done.wait [#allocation5], 32  }
 0x10c   :  { %612 = vsyncadd [#allocation5], 4294967264 }
 0x10d   :  { %379 = vsyncpa [#allocation5], 1 }
 0x10e   :  { %380 = vsyncmov [#allocation3] }
 0x111   :  { %s381_s4 = vpop.sfrf %380 }
 0x112   :  { %p501_p8 = scmp.ne.s32.totalorder %s381_s4, 0 }
 0x114   :  { %385 = shalt.err (%p501_p8)  }
 0x115   :  { %387 = vsyncmov [#allocation3 + $0x1] }
 0x118   :  { %s388_s5 = vpop.sfrf %387 }
 0x119   :  { %p502_p9 = scmp.ne.s32.totalorder %s388_s5, 0 }
 0x11b   :  { %392 = shalt.err (%p502_p9)  }
 0x11c   :  { %394 = vsyncmov [#allocation3 + $0x2] }
 0x11f   :  { %s395_s6 = vpop.sfrf %394 }
 0x120   :  { %p503_p10 = scmp.ne.s32.totalorder %s395_s6, 0 }
 0x122   :  { %399 = shalt.err (%p503_p10)  }
 0x123   :  { %401 = vsyncmov [#allocation3 + $0x3] }
 0x126   :  { %s402_s7 = vpop.sfrf %401 }
 0x127   :  { %p504_p11 = scmp.ne.s32.totalorder %s402_s7, 0 }
 0x129   :  { %406 = shalt.err (%p504_p11)  }

</bundles_post_ra>
